<compile_context>
chip_gen: v7x
topology: tpu7x:2x2x1
jax: 0.10.0
libtpu: 0.0.40
codegen_flags: <defaults>
</compile_context>

<pallas_src>
import math

import jax
import jax.numpy as jnp
from jax.experimental import pallas as pl
from jax.experimental.pallas import tpu as pltpu


def _layer_scale_kernel(x_ref, gamma_ref, o_ref):
    # gamma's block index depends only on the column grid index, so it stays
    # resident in VMEM across the row sweep; read the single row and broadcast.
    g = gamma_ref[0, :]
    o_ref[...] = (x_ref[...] * g).astype(o_ref.dtype)


def _detect_tpu():
    """Best-effort (generation, tensorcores_per_chip); safe fallback (0, 1)."""
    kind = ""
    try:
        kind = (jax.devices()[0].device_kind or "").lower()
    except Exception:
        pass
    gen = 0
    for g in (7, 6, 5, 4):
        if f"v{g}" in kind or f"tpu{g}" in kind:
            gen = g
            break
    num_tc = 2 if gen >= 7 else 1  # only v7x has 2 independent TensorCores/chip
    return gen, num_tc


def _round_down(v, mult):
    return (v // mult) * mult


def _round_up(v, mult):
    return -(-v // mult) * mult


def layer_scale(x: jax.Array, gamma: jax.Array, *,
                out_dtype=None,
                target_block_bytes: int | None = None,
                donate_x: bool = False) -> jax.Array:
    """LayerScale forward: x * gamma with gamma broadcast over the last axis."""
    orig_shape = x.shape
    d = orig_shape[-1]
    assert gamma.shape == (d,), f"gamma must be ({d},), got {gamma.shape}"

    # Default mirrors PyTorch `x * gamma` promotion (e.g. bf16 * f32 -> f32).
    # Pass out_dtype=x.dtype to keep bf16 outputs (saves ~33% HBM write traffic).
    if out_dtype is None:
        out_dtype = jnp.result_type(x.dtype, gamma.dtype)
    out_dtype = jnp.dtype(out_dtype)

    gen, num_tc = _detect_tpu()
    if target_block_bytes is None:
        target_block_bytes = {7: 6 << 20, 6: 4 << 20}.get(gen, 3 << 20)

    rows = math.prod(orig_shape[:-1]) if len(orig_shape) > 1 else 1

    itemsize_in = jnp.dtype(x.dtype).itemsize
    itemsize_out = out_dtype.itemsize
    # Sublane granularity (8 for 4-byte, 16 for 2-byte, 32 for 1-byte); block_rows
    # must satisfy both the input and the output tile.
    sublane = max(8, 32 // max(1, min(itemsize_in, itemsize_out)))

    # --- Lane densification: make the (output) last dim a multiple of 128. ---
    k = 128 // math.gcd(d, 128)            # smallest k with (k*d) % 128 == 0
    if k > 1 and rows % k == 0:
        width = d * k
        m = rows // k
        gamma2 = jnp.tile(gamma, k).reshape(1, width)
    else:
        # TODO(synk): when rows % k != 0, every "fix" (pad rows / split + concat)
        # costs an extra full HBM copy outside the kernel, so we keep the exact
        # full-width fallback (stores may be lane-masked, semantics unchanged).
        k = 1
        width = d
        m = rows
        gamma2 = gamma.reshape(1, d)
    x2 = x.reshape(m, width)

    # --- Column (lane) tiling guard for very wide rows; only legal when the
    #     width is a multiple of 128, otherwise full extent is required. ---
    if width % 128 == 0:
        max_cols = max(128, _round_down(target_block_bytes // (sublane * itemsize_in), 128))
        if width <= max_cols:
            block_cols = width
        else:
            block_cols = 128
            c = 128
            while c <= width:                      # largest 128-multiple divisor
                if width % c == 0 and c <= max_cols:
                    block_cols = c
                c += 128
    else:
        block_cols = width

    # --- Sublane-aligned, VMEM-sized row block. ---
    row_bytes = block_cols * itemsize_in
    block_rows = max(sublane, _round_down(target_block_bytes // max(1, row_bytes), sublane))
    if block_rows >= m:
        block_rows = m                             # full extent is always legal

    grid_rows = pl.cdiv(m, block_rows)
    grid_cols = pl.cdiv(width, block_cols)

    # On 2-TensorCore chips (v7x) make sure both cores get balanced work.
    if num_tc >= 2 and grid_cols == 1:
        if grid_rows == 1 and m > sublane:
            half = _round_up(_round_up(m, 2) // 2, sublane)
            if 0 < half < m:
                block_rows = half
                grid_rows = pl.cdiv(m, block_rows)
        elif grid_rows > 1 and grid_rows % 2 == 1:
            cand = max(sublane, _round_up(pl.cdiv(m, grid_rows + 1), sublane))
            if cand < block_rows and pl.cdiv(m, cand) % 2 == 0:
                block_rows = cand
                grid_rows = pl.cdiv(m, cand)

    # Grid-axis semantics: only CORE_PARALLEL actually shards across TCs; plain
    # "parallel" is kept on 1-TC chips (no codegen risk, no behavior change).
    if num_tc >= 2:
        if grid_rows >= grid_cols:
            sems = (pltpu.CORE_PARALLEL, pltpu.PARALLEL)
        else:
            sems = (pltpu.PARALLEL, pltpu.CORE_PARALLEL)
    else:
        sems = ("parallel", "parallel")

    # Explicit scoped-VMEM budget: double-buffered in + out tiles + gamma row,
    # plus headroom; floor of 32 MiB is safe on every generation (<= v7x 64 MiB).
    gamma_itemsize = jnp.dtype(gamma.dtype).itemsize
    footprint = (2 * block_rows * block_cols * (itemsize_in + itemsize_out)
                 + 2 * block_cols * gamma_itemsize)
    vmem_limit = int(max(footprint + (4 << 20), 32 << 20))

    # PyTorch inplace=True (x.mul_) has no JAX equivalent; opt-in buffer reuse.
    io_aliases = {}
    if donate_x and out_dtype == x.dtype:
        io_aliases = {0: 0}

    out = pl.pallas_call(
        _layer_scale_kernel,
        out_shape=jax.ShapeDtypeStruct((m, width), out_dtype),
        grid_spec=pltpu.PrefetchScalarGridSpec(
            num_scalar_prefetch=0,
            grid=(grid_rows, grid_cols),
            in_specs=[
                pl.BlockSpec((block_rows, block_cols), lambda i, j: (i, j)),
                pl.BlockSpec((1, block_cols), lambda i, j: (0, j)),
            ],
            out_specs=pl.BlockSpec((block_rows, block_cols), lambda i, j: (i, j)),
        ),
        compiler_params=pltpu.CompilerParams(
            dimension_semantics=sems,
            vmem_limit_bytes=vmem_limit,
        ),
        input_output_aliases=io_aliases,
    )(x2, gamma2)
    return out.reshape(orig_shape)


if __name__ == "__main__":
    # Deterministic params, matching nn.Parameter(torch.ones(dim) * init_values).
    dim = 32
    init_values = 1e-5
    gamma = jnp.ones((dim,), dtype=jnp.float32) * init_values

    key = jax.random.PRNGKey(0)
    k0, k1, k2, k3, k4 = jax.random.split(key, 5)

    # 1) Main small case (batch=2, seq=8, hidden=32): densified to lane width 128.
    x = jax.random.normal(k0, (2, 8, dim), dtype=jnp.float32)
    out = layer_scale(x, gamma)
    jax.block_until_ready(out)
    ref = x * gamma
    assert out.shape == x.shape and out.dtype == ref.dtype
    assert jnp.allclose(out, ref, atol=1e-6, rtol=1e-6)

    # 2) Multi-step row grid + partial trailing row tile.
    gamma_b = jnp.ones((64,), dtype=jnp.float32) * init_values
    x_b = jax.random.normal(k1, (2, 37, 64), dtype=jnp.float32)
    out_b = layer_scale(x_b, gamma_b, target_block_bytes=16 * 1024)
    jax.block_until_ready(out_b)
    assert jnp.allclose(out_b, x_b * gamma_b, atol=1e-6, rtol=1e-6)

    # 3) Ragged fallback path (rows=15 not divisible by densification factor 4).
    x_c = jax.random.normal(k2, (3, 5, dim), dtype=jnp.float32)
    out_c = layer_scale(x_c, gamma)
    jax.block_until_ready(out_c)
    assert jnp.allclose(out_c, x_c * gamma, atol=1e-6, rtol=1e-6)

    # 4) Wide-row guard: 2-D (row x col) grid with column tiling (block_cols=256).
    gamma_d = jnp.ones((512,), dtype=jnp.float32) * init_values
    x_d = jax.random.normal(k3, (2, 8, 512), dtype=jnp.float32)
    out_d = layer_scale(x_d, gamma_d, target_block_bytes=8 * 1024)
    jax.block_until_ready(out_d)
    assert jnp.allclose(out_d, x_d * gamma_d, atol=1e-6, rtol=1e-6)

    # 5) bf16 activations: default promotes like PyTorch; out_dtype=x.dtype keeps bf16.
    gamma_e = jnp.ones((128,), dtype=jnp.float32) * init_values
    x_e = jax.random.normal(k4, (2, 16, 128), dtype=jnp.bfloat16)
    out_e = layer_scale(x_e, gamma_e)                          # promoted -> f32
    out_e16 = layer_scale(x_e, gamma_e, out_dtype=x_e.dtype)   # bf16 out
    jax.block_until_ready((out_e, out_e16))
    ref_e = x_e * gamma_e
    assert out_e.dtype == ref_e.dtype
    assert jnp.allclose(out_e, ref_e, atol=1e-6, rtol=1e-6)
    assert out_e16.dtype == x_e.dtype
    assert jnp.allclose(out_e16.astype(jnp.float32), ref_e, atol=1e-6, rtol=1e-2)

    print("KERNEL_OK")
</pallas_src>

<mosaic_0001>
module attributes {stable_mosaic.version = 11 : i64} {
  func.func @_layer_scale_kernel(%arg0: i32, %arg1: i32, %arg2: memref<4x128xf32, #tpu.memory_space<vmem>>, %arg3: memref<1x128xf32, #tpu.memory_space<vmem>>, %arg4: memref<4x128xf32, #tpu.memory_space<vmem>>) attributes {dimension_semantics = [#tpu.dimension_semantics<parallel>, #tpu.dimension_semantics<parallel>], iteration_bounds = array<i64: 1, 1>, scalar_prefetch = 0 : i64, scratch_operands = 0 : i64, tpu.core_type = #tpu.core_type<tc>, window_params = [{transform_indices = @transform_0, window_bounds = array<i64: 4, 128>}, {transform_indices = @transform_1, window_bounds = array<i64: 1, 128>}, {transform_indices = @transform_2, window_bounds = array<i64: 4, 128>}]} {
    %c0 = arith.constant 0 : index
    %c0_0 = arith.constant 0 : index
    %0 = vector.load %arg3[%c0, %c0_0] : memref<1x128xf32, #tpu.memory_space<vmem>>, vector<1x128xf32>
    %1 = vector.shape_cast %0 : vector<1x128xf32> to vector<128xf32>
    %c0_1 = arith.constant 0 : index
    %c0_2 = arith.constant 0 : index
    %2 = vector.load %arg2[%c0_1, %c0_2] : memref<4x128xf32, #tpu.memory_space<vmem>>, vector<4x128xf32>
    %3 = vector.shape_cast %1 : vector<128xf32> to vector<1x128xf32>
    %4 = vector.broadcast %3 : vector<1x128xf32> to vector<4x128xf32>
    %5 = arith.mulf %2, %4 : vector<4x128xf32>
    %c0_3 = arith.constant 0 : index
    %c0_4 = arith.constant 0 : index
    %6 = vector.load %arg4[%c0_3, %c0_4] : memref<4x128xf32, #tpu.memory_space<vmem>>, vector<4x128xf32>
    tpu.vector_store %arg4[%c0_3, %c0_4], %5 {strides = array<i32>} : memref<4x128xf32, #tpu.memory_space<vmem>>, vector<4x128xf32>,
    return
  }
  func.func @transform_0(%arg0: i32, %arg1: i32) -> (i32, i32) {
    %c0_i32 = arith.constant 0 : i32
    return %arg0, %arg1 : i32, i32
  }
  func.func @transform_1(%arg0: i32, %arg1: i32) -> (i32, i32) {
    %c0_i32 = arith.constant 0 : i32
    %c0_i32_0 = arith.constant 0 : i32
    return %c0_i32, %arg1 : i32, i32
  }
  func.func @transform_2(%arg0: i32, %arg1: i32) -> (i32, i32) {
    %c0_i32 = arith.constant 0 : i32
    return %arg0, %arg1 : i32, i32
  }
}

</mosaic_0001>

<bundles_post_ra>
// kernel: tpu_custom_call.1
= control target key start
LH: loop header
LB: loop body
LE: loop exit
PB: predicated region body
PF: predicated region fallthrough
CT: control target
= control target key end

     0   :  { %7 = vsyncpa [#allocation3], 0  ;;  %s144_s0 = inlined_call_operand.hbm [shape: f32[4,128], index: 0, kind: input, shape index: {}]   ;;  %s145_s1 = inlined_call_operand.vmem [shape: f32[1,128], index: 1, kind: input, shape index: {}]   ;;  %s146_s2 = inlined_call_operand.hbm [shape: f32[4,128], index: 2, kind: output, shape index: {}]  }
   0x1   :  { %8 = vsyncpa [#allocation4], 0  ;;  %s100_s9 = smov [#allocation2]   ;;  %s52_s13 = scalar_lea.hbm %s144_s0, 64 }
   0x2   :  { %s15_s10 = sshll.u32 %s100_s9, 4  ;;  %p53_p0 = scmp.ne.s32.totalorder %s144_s0, %s52_s13  ;;  %s16_s10 = int_to_ptr.vmem [resolvable:$true] %s15_s10 }
   0x3   :  { %p56_p1 = scmp.lt.u32.totalorder %s52_s13, %s144_s0 }
   0x5   :  { %p58_p2 = pnand %p56_p1, %p53_p0 }
   0x7   :  { %61 = shalt.err (!%p58_p2)
}
   0x8   :  { %s62_s18 = scalar_lea.vmem %s16_s10, 64  ;;  %p67_p4 = scmp.lt.s32.totalorder %s16_s10, %s16_s10 }
   0x9   :  { %p63_p3 = scmp.ne.s32.totalorder %s16_s10, %s62_s18  ;;  %p68_p5 = scmp.lt.s32.totalorder %s62_s18, %s62_s18 }
   0xb   :  { %p69_p6 = por %p68_p5, %p67_p4 }
   0xd   :  { %p70_p7 = pnand %p69_p6, %p63_p3 }
   0xf   :  { %73 = shalt.err (!%p70_p7)
}
  0x10   :  { %18 = dma.hbm_to_vmem [thread:$0]  %s144_s0, 64, %s16_s10, [#allocation3]  }
  0x11   :  { %96 = dma.done.wait [#allocation3], 64  }
  0x12   :  { %97 = vsyncadd [#allocation3], 4294967232  ;;  %s101_s21 = smov [#allocation5]   ;;  %v49_v0 = vld [vmem:[%s145_s1] ss:$0 sm:$0xff] }
  0x13   :  { %s40_s22 = sshll.u32 %s101_s21, 4  ;;  %v25_v1 = vld [vmem:[#allocation2] sm:$0xf]  ;;  %s41_s22 = int_to_ptr.vmem [resolvable:$true] %s40_s22 }
  0x14   :  { %v32_v2 = vmul.f32 %v49_v0, %v25_v1  ;;  %s74_s25 = scalar_lea.vmem %s41_s22, 64  ;;  %p79_p9 = scmp.lt.s32.totalorder %s41_s22, %s41_s22 }
  0x15   :  { %p75_p8 = scmp.ne.s32.totalorder %s41_s22, %s74_s25  ;;  %p80_p10 = scmp.lt.s32.totalorder %s74_s25, %s74_s25 }
  0x16   :  { %33 = vst [vmem:[#allocation5] sm:$0xf] %v32_v2 }
  0x17   :  { %p81_p11 = por %p80_p10, %p79_p9 }
  0x19   :  { %p82_p12 = pnand %p81_p11, %p75_p8 }
  0x1b   :  { %85 = shalt.err (!%p82_p12)
}
  0x1c   :  { %s86_s27 = scalar_lea.hbm %s146_s2, 64 }
  0x1d   :  { %p87_p13 = scmp.ne.s32.totalorder %s146_s2, %s86_s27  ;;  %p90_p0 = scmp.lt.u32.totalorder %s86_s27, %s146_s2 }
  0x1f   :  { %p92_p1 = pnand %p90_p0, %p87_p13 }
  0x21   :  { %95 = shalt.err (!%p92_p1)
}
  0x22   :  { %43 = dma.vmem_to_hbm [thread:$0]  %s41_s22, 64, %s146_s2, [#allocation4]  }
  0x23   :  { %98 = dma.done.wait [#allocation4], 64  }
  0x24   :  { %99 = vsyncadd [#allocation4], 4294967232 }
  0x25   :  { %47 = vsyncpa [#allocation3], 1 }
  0x26   :  { %48 = vsyncpa [#allocation4], 1 }

</bundles_post_ra>
